<compile_context>
chip_gen: v6e
topology: v6e:2x2x1
jax: 0.10.0
libtpu: 0.0.40
codegen_flags: <defaults>
</compile_context>

<pallas_src>
import jax
import jax.numpy as jnp
from jax.experimental import pallas as pl
from jax.experimental.pallas import tpu as pltpu


def _round_up(x: int, m: int) -> int:
    return ((x + m - 1) // m) * m


def _uni_reaction_kernel(params_ref, s_ref, e_ref, o_ref):
    # params_ref: SMEM scalar-prefetch array [kcat, kma] (f32).
    kcat = params_ref[0]
    kma = params_ref[1]
    # Upcast in-kernel so HBM traffic stays in the native (possibly 16-bit) dtype.
    s = s_ref[...].astype(jnp.float32)
    e = e_ref[...].astype(jnp.float32)
    # Same op ordering as the PyTorch forward: kcat * enzyme * (s / (kma + s)).
    o_ref[...] = (kcat * e * (s / (kma + s))).astype(o_ref.dtype)


_SMALL_TOTAL = 1024  # below this a pallas_call launch is pure overhead


def uni_reaction(substrate: jax.Array, enzyme: jax.Array,
                 kcat, kma, *,
                 target_block_bytes: int = 2 * 1024 * 1024) -> jax.Array:
    """Pallas implementation of UniReaction.forward for arbitrary-shaped inputs."""
    assert substrate.shape == enzyme.shape, "substrate/enzyme shapes must match"
    orig_shape = substrate.shape
    orig_dtype = substrate.dtype
    total = substrate.size

    kcat32 = jnp.float32(kcat)
    kma32 = jnp.float32(kma)

    if total == 0:
        return jnp.zeros(orig_shape, orig_dtype)

    # Tiny-input bypass: let XLA fuse this trivial elementwise op instead.
    if total < _SMALL_TOTAL:
        s32 = substrate.astype(jnp.float32)
        e32 = enzyme.astype(jnp.float32)
        return (kcat32 * e32 * (s32 / (kma32 + s32))).astype(orig_dtype)

    # ---- shape the data into a lane-dense 2-D slab --------------------------
    lane_width = None
    for lw in (512, 256, 128):
        if total % lw == 0:
            lane_width = lw
            break

    if lane_width is not None:
        # Zero-copy path: contiguous row-major reshape is a bitcast, no HBM pass.
        pad = 0
        rows = total // lane_width
        s2 = substrate.reshape(rows, lane_width)
        e2 = enzyme.reshape(rows, lane_width)
    else:
        # Ragged total: pad to the next multiple of 128 (<= 127 dead elements).
        lane_width = 128
        padded_total = _round_up(total, lane_width)
        pad = padded_total - total
        s2 = jnp.pad(substrate.reshape(-1), (0, pad),
                     constant_values=1).reshape(-1, lane_width)
        e2 = jnp.pad(enzyme.reshape(-1), (0, pad),
                     constant_values=0).reshape(-1, lane_width)
        rows = padded_total // lane_width

    # ---- block sizing --------------------------------------------------------
    itemsize = jnp.dtype(orig_dtype).itemsize
    min_sublane = {4: 8, 2: 16, 1: 32}.get(itemsize, 8)

    max_block_rows = max(
        min_sublane,
        (target_block_bytes // (lane_width * itemsize)) // min_sublane * min_sublane,
    )

    n_steps = pl.cdiv(rows, max_block_rows)
    if n_steps > 1 and n_steps % 2 == 1:
        n_steps += 1  # even split across v7x's two TensorCores
    block_rows = _round_up(pl.cdiv(rows, n_steps), min_sublane)
    if block_rows >= rows:
        block_rows = rows  # single block equal to the full array dim (always legal)
    grid_steps = pl.cdiv(rows, block_rows)

    params = jnp.stack([kcat32, kma32])

    spec = pl.BlockSpec((block_rows, lane_width), lambda i, p: (i, 0))
    out = pl.pallas_call(
        _uni_reaction_kernel,
        out_shape=jax.ShapeDtypeStruct((rows, lane_width), orig_dtype),
        grid_spec=pltpu.PrefetchScalarGridSpec(
            num_scalar_prefetch=1,
            grid=(grid_steps,),
            in_specs=[spec, spec],
            out_specs=spec,
        ),
        compiler_params=pltpu.CompilerParams(
            dimension_semantics=("parallel",),
            vmem_limit_bytes=32 * 1024 * 1024,
        ),
    )(params, s2, e2)

    if pad:
        out = out.reshape(-1)[:total]
    return out.reshape(orig_shape)


if __name__ == "__main__":
    # Deterministic parameters (matching UniReaction.__init__ scalar Parameters).
    KCAT = 2.5
    KMA = 0.7

    key = jax.random.PRNGKey(0)
    k1, k2, k3, k4, k5, k6, k7, k8 = jax.random.split(key, 8)

    def ref_fn(s, e):
        s32 = s.astype(jnp.float32)
        e32 = e.astype(jnp.float32)
        return KCAT * e32 * (s32 / (KMA + s32))

    # 1) Small f32 tensor on the zero-copy fast path (total % 512 == 0).
    s_a = jax.random.uniform(k1, (16, 128), jnp.float32, minval=0.0, maxval=5.0)
    e_a = jax.random.uniform(k2, (16, 128), jnp.float32, minval=0.0, maxval=1.0)
    out_a = jax.block_until_ready(uni_reaction(s_a, e_a, KCAT, KMA))
    ref_a = ref_fn(s_a, e_a)
    assert out_a.shape == ref_a.shape and out_a.dtype == jnp.float32
    assert jnp.allclose(out_a, ref_a, atol=1e-6, rtol=1e-6)

    # 2) Ragged f32 tensor exercising the pad fallback path.
    s_b = jax.random.uniform(k3, (7, 193), jnp.float32, minval=0.0, maxval=5.0)
    e_b = jax.random.uniform(k4, (7, 193), jnp.float32, minval=0.0, maxval=1.0)
    out_b = jax.block_until_ready(uni_reaction(s_b, e_b, KCAT, KMA))
    assert jnp.allclose(out_b, ref_fn(s_b, e_b), atol=1e-6, rtol=1e-6)

    # 3) bf16 tensor: native-dtype streaming, in-kernel f32 compute, bf16 output.
    s_c = jax.random.uniform(k5, (32, 512), jnp.float32, minval=0.0, maxval=5.0).astype(jnp.bfloat16)
    e_c = jax.random.uniform(k6, (32, 512), jnp.float32, minval=0.0, maxval=1.0).astype(jnp.bfloat16)
    out_c = jax.block_until_ready(uni_reaction(s_c, e_c, KCAT, KMA))
    assert out_c.dtype == jnp.bfloat16
    assert jnp.allclose(out_c.astype(jnp.float32),
                        ref_fn(s_c, e_c), atol=1e-2, rtol=1e-2)

    # 4) Multi-step grid (small target block -> 8 pipelined steps).
    s_d = jax.random.uniform(k7, (256, 512), jnp.float32, minval=0.0, maxval=5.0)
    e_d = jax.random.uniform(k8, (256, 512), jnp.float32, minval=0.0, maxval=1.0)
    out_d = jax.block_until_ready(
        uni_reaction(s_d, e_d, KCAT, KMA, target_block_bytes=64 * 1024))
    assert jnp.allclose(out_d, ref_fn(s_d, e_d), atol=1e-6, rtol=1e-6)

    print("KERNEL_OK")
</pallas_src>

<mosaic_0001>
module attributes {stable_mosaic.version = 11 : i64} {
  func.func @_uni_reaction_kernel(%arg0: i32, %arg1: memref<2xf32, #tpu.memory_space<smem>>, %arg2: memref<4x512xf32, #tpu.memory_space<vmem>>, %arg3: memref<4x512xf32, #tpu.memory_space<vmem>>, %arg4: memref<4x512xf32, #tpu.memory_space<vmem>>) attributes {dimension_semantics = [#tpu.dimension_semantics<parallel>], iteration_bounds = array<i64: 1>, scalar_prefetch = 1 : i64, scratch_operands = 0 : i64, tpu.core_type = #tpu.core_type<tc>, window_params = [{transform_indices = @transform_0, window_bounds = array<i64: 4, 512>}, {transform_indices = @transform_1, window_bounds = array<i64: 4, 512>}, {transform_indices = @transform_2, window_bounds = array<i64: 4, 512>}]} {
    %c0 = arith.constant 0 : index
    %0 = memref.load %arg1[%c0] : memref<2xf32, #tpu.memory_space<smem>>
    %c1 = arith.constant 1 : index
    %1 = memref.load %arg1[%c1] : memref<2xf32, #tpu.memory_space<smem>>
    %c0_0 = arith.constant 0 : index
    %c0_1 = arith.constant 0 : index
    %2 = vector.load %arg2[%c0_0, %c0_1] : memref<4x512xf32, #tpu.memory_space<vmem>>, vector<4x512xf32>
    %c0_2 = arith.constant 0 : index
    %c0_3 = arith.constant 0 : index
    %3 = vector.load %arg3[%c0_2, %c0_3] : memref<4x512xf32, #tpu.memory_space<vmem>>, vector<4x512xf32>
    %4 = vector.broadcast %0 : f32 to vector<4x512xf32>
    %5 = arith.mulf %4, %3 : vector<4x512xf32>
    %6 = vector.broadcast %1 : f32 to vector<4x512xf32>
    %7 = arith.addf %6, %2 : vector<4x512xf32>
    %8 = arith.divf %2, %7 : vector<4x512xf32>
    %9 = arith.mulf %5, %8 : vector<4x512xf32>
    %c0_4 = arith.constant 0 : index
    %c0_5 = arith.constant 0 : index
    %10 = vector.load %arg4[%c0_4, %c0_5] : memref<4x512xf32, #tpu.memory_space<vmem>>, vector<4x512xf32>
    tpu.vector_store %arg4[%c0_4, %c0_5], %9 {strides = array<i32>} : memref<4x512xf32, #tpu.memory_space<vmem>>, vector<4x512xf32>,
    return
  }
  func.func @transform_0(%arg0: i32, %arg1: memref<2xf32, #tpu.memory_space<smem>>) -> (i32, i32) {
    %c0_i32 = arith.constant 0 : i32
    %c0_i32_0 = arith.constant 0 : i32
    return %arg0, %c0_i32 : i32, i32
  }
  func.func @transform_1(%arg0: i32, %arg1: memref<2xf32, #tpu.memory_space<smem>>) -> (i32, i32) {
    %c0_i32 = arith.constant 0 : i32
    %c0_i32_0 = arith.constant 0 : i32
    return %arg0, %c0_i32 : i32, i32
  }
  func.func @transform_2(%arg0: i32, %arg1: memref<2xf32, #tpu.memory_space<smem>>) -> (i32, i32) {
    %c0_i32 = arith.constant 0 : i32
    %c0_i32_0 = arith.constant 0 : i32
    return %arg0, %c0_i32 : i32, i32
  }
}

</mosaic_0001>

<bundles_post_ra>
// kernel: tpu_custom_call.1
= control target key start
LH: loop header
LB: loop body
LE: loop exit
PB: predicated region body
PF: predicated region fallthrough
CT: control target
= control target key end

     0   :  { %s162_s12 = smov [#allocation3]   ;;  %s198_s0 = inlined_call_operand.hbm [shape: f32[2], index: 0, kind: input, shape index: {}]   ;;  %s199_s1 = inlined_call_operand.hbm [shape: f32[4,512], index: 1, kind: input, shape index: {}]   ;;  %s200_s2 = inlined_call_operand.hbm [shape: f32[4,512], index: 2, kind: input, shape index: {}]   ;;  %s201_s3 = inlined_call_operand.hbm [shape: f32[4,512], index: 3, kind: output, shape index: {}]  }
   0x1   :  { %9 = dma.hbm_to_smem %s198_s0, 16, %s162_s12, [#allocation2] }
   0x2   :  { %154 = dma.done.wait [#allocation2], 16 }
   0x3   :  { %155 = vsyncadd [#allocation2], 4294967280 }
   0x4   :  { %11 = sfence }
   0x5   :  { %12 = vsyncpa [#allocation5], 0 }
   0x6   :  { %13 = vsyncpa [#allocation8], 0 }
   0x7   :  { %14 = vsyncpa [#allocation6], 0  ;;  %s163_s15 = smov [#allocation4]   ;;  %s164_s17 = smov [#allocation7]  }
   0x8   :  { %s21_s16 = sshll.u32 %s163_s15, 4  ;;  %s31_s18 = sshll.u32 %s164_s17, 4  ;;  %s22_s16 = int_to_ptr.vmem [resolvable:$true] %s21_s16  ;;  %s32_s18 = int_to_ptr.vmem [resolvable:$true] %s31_s18 }
   0x9   :  { %s102_s19 = scalar_lea.vmem %s22_s16, 256  ;;  %p107_p1 = scmp.lt.s32.totalorder %s22_s16, %s22_s16 }
   0xa   :  { %p103_p0 = scmp.ne.s32.totalorder %s22_s16, %s102_s19  ;;  %p108_p2 = scmp.lt.s32.totalorder %s102_s19, %s102_s19 }
   0xc   :  { %p109_p3 = por %p108_p2, %p107_p1 }
   0xe   :  { %p110_p4 = pnand %p109_p3, %p103_p0 }
  0x10   :  { %113 = shalt.err (!%p110_p4)
}
  0x11   :  { %24 = dma.hbm_to_vmem [thread:$0]  %s199_s1, 256, %s22_s16, [#allocation5]  }
  0x12   :  { %s122_s21 = scalar_lea.vmem %s32_s18, 256  ;;  %p127_p6 = scmp.lt.s32.totalorder %s32_s18, %s32_s18 }
  0x13   :  { %p123_p5 = scmp.ne.s32.totalorder %s32_s18, %s122_s21  ;;  %p128_p7 = scmp.lt.s32.totalorder %s122_s21, %s122_s21 }
  0x15   :  { %p129_p8 = por %p128_p7, %p127_p6 }
  0x17   :  { %p130_p9 = pnand %p129_p8, %p123_p5 }
  0x19   :  { %133 = shalt.err (!%p130_p9)
}
  0x1a   :  { %34 = dma.hbm_to_vmem [thread:$0]  %s200_s2, 256, %s32_s18, [#allocation8]  }
  0x1b   :  { %156 = dma.done.wait [#allocation5], 256  }
  0x1c   :  { %157 = vsyncadd [#allocation5], 4294967040 }
  0x1d   :  { %158 = dma.done.wait [#allocation8], 256  }
  0x1e   :  { %159 = vsyncadd [#allocation8], 4294967040  ;;  %s77_s24 = sld [smem:[#allocation3 + $0x1]]  ;;  %v43_v0 = vld [vmem:[#allocation4] sm:$0xff]  ;;  %v44_v1 = vld [vmem:[#allocation4 + $0x8] sm:$0xff]  ;;  %s165_s2 = smov [#allocation9]  }
  0x1f   :  { %s41_s1 = sld [smem:[#allocation3]]  ;;  %v45_v5 = vld [vmem:[#allocation7] sm:$0xff]  ;;  %v46_v7 = vld [vmem:[#allocation7 + $0x8] sm:$0xff]  ;;  %s67_s25 = sshll.u32 %s165_s2, 4  ;;  %s68_s25 = int_to_ptr.vmem [resolvable:$true] %s67_s25 }
  0x20   :  { %s134_s26 = scalar_lea.vmem %s68_s25, 256  ;;  %p139_p11 = scmp.lt.s32.totalorder %s68_s25, %s68_s25 }
  0x21   :  { %p135_p10 = scmp.ne.s32.totalorder %s68_s25, %s134_s26  ;;  %p140_p12 = scmp.lt.s32.totalorder %s134_s26, %s134_s26 }
  0x23   :  { %p141_p13 = por %p140_p12, %p139_p11 }
  0x24   :  { %v50_v2 = vstv %s77_s24 }
  0x25   :  { %v51_v3 = vadd.f32 %v50_v2, %v43_v0  ;;  %v52_v4 = vadd.f32 %v50_v2, %v44_v1  ;;  %v47_v6 = vstv %s41_s1  ;;  %p142_p0 = pnand %p141_p13, %p135_p10 }
  0x26   :  { %v48_v8 = vmul.f32 %v47_v6, %v45_v5  ;;  %v49_v10 = vmul.f32 %v47_v6, %v46_v7 }
  0x27   :  { %82 = vrcp.f32 %v51_v3 }
  0x28   :  { %84 = vrcp.f32 %v52_v4 }
  0x34   :  { %v83_v9 = vpop.eup %82 }
  0x35   :  { %v85_v11 = vpop.eup %84  ;;  %v54_v12 = vmul.f32 %v83_v9, %v43_v0 }
  0x36   :  { %v56_v13 = vmul.f32 %v85_v11, %v44_v1 }
  0x37   :  { %v57_v14 = vmul.f32 %v54_v12, %v48_v8 }
  0x38   :  { %v58_v15 = vmul.f32 %v56_v13, %v49_v10 }
  0x39   :  { %59 = vst [vmem:[#allocation9] sm:$0xff] %v57_v14 }
  0x3a   :  { %60 = vst [vmem:[#allocation9 + $0x8] sm:$0xff] %v58_v15 }
  0x3b   :  { %145 = shalt.err (!%p142_p0)
}
  0x3c   :  { %70 = dma.vmem_to_hbm [thread:$0]  %s68_s25, 256, %s201_s3, [#allocation6]  }
  0x3d   :  { %160 = dma.done.wait [#allocation6], 256  }
  0x3e   :  { %161 = vsyncadd [#allocation6], 4294967040 }
  0x3f   :  { %74 = vsyncpa [#allocation5], 1 }
  0x40   :  { %75 = vsyncpa [#allocation8], 1 }
  0x41   :  { %76 = vsyncpa [#allocation6], 1 }

</bundles_post_ra>
